<compile_context>
chip_gen: v7x
topology: tpu7x:2x2x1
jax: 0.10.0
libtpu: 0.0.40
codegen_flags: <defaults>
</compile_context>

<pallas_src>
import jax
import jax.numpy as jnp
from jax.experimental import pallas as pl
from jax.experimental.pallas import tpu as pltpu

NEG_INF = -1e30
OUT_PAD = 128  # lane-dense logits width (real classes = 10)


def _round_up(n, m):
    return ((n + m - 1) // m) * m


def mlp_softmax_kernel(x_ref, w1_ref, b1_ref, w2_ref, b2_ref, w3_ref, b3_ref, o_ref):
    # Load biases once per tile (avoid re-materializing broadcasts per use).
    b1 = b1_ref[...]
    b2 = b2_ref[...]
    b3 = b3_ref[...]

    # fc1 + relu
    h1 = jnp.dot(x_ref[...], w1_ref[...], preferred_element_type=jnp.float32)
    h1 = jnp.maximum(h1 + b1, 0.0)

    # fc2 + relu
    h2 = jnp.dot(h1, w2_ref[...], preferred_element_type=jnp.float32)
    h2 = jnp.maximum(h2 + b2, 0.0)

    # fc3 -- padded to 128 lane-dense output columns; pad columns carry a
    # -1e30 bias so exp() of them contributes exactly 0 to the softmax denom.
    logits = jnp.dot(h2, w3_ref[...], preferred_element_type=jnp.float32) + b3

    # Numerically stable softmax over the feature axis (exact division: the
    # approximate EUP reciprocal was not accurate enough for row sums == 1).
    m = jnp.max(logits, axis=-1, keepdims=True)
    e = jnp.exp(logits - m)
    denom = jnp.sum(e, axis=-1, keepdims=True)
    o_ref[...] = (e / denom).astype(o_ref.dtype)


def network_forward(x, params, *, tm=256):
    """Forward pass of the PyTorch Network module (softmax output, 10 classes)."""
    w1, b1, w2, b2, w3, b3 = params
    batch, feat = x.shape
    assert feat == 784

    # Lane-dense output: zero-pad w3 columns, -1e30-pad b3 columns 10..127.
    w3p = jnp.zeros((w3.shape[0], OUT_PAD), w3.dtype).at[:, :10].set(w3)
    b3p = jnp.full((1, OUT_PAD), NEG_INF, b3.dtype).at[:, :10].set(b3)

    # Batch tiling: tile must be a multiple of 8 sublanes; pad batch to a
    # multiple of the tile (zero rows are computed then discarded).
    tm = min(tm, _round_up(batch, 8))
    padded_batch = _round_up(batch, tm)
    if padded_batch != batch:
        x = jnp.pad(x, ((0, padded_batch - batch), (0, 0)))
    grid = (pl.cdiv(padded_batch, tm),)

    # Weights/biases stay resident in VMEM across all batch tiles.
    resident = lambda arr: pl.BlockSpec(arr.shape, lambda i: (0,) * arr.ndim)

    out = pl.pallas_call(
        mlp_softmax_kernel,
        out_shape=jax.ShapeDtypeStruct((padded_batch, OUT_PAD), jnp.float32),
        grid_spec=pltpu.PrefetchScalarGridSpec(
            num_scalar_prefetch=0,
            grid=grid,
            in_specs=[
                pl.BlockSpec((tm, 784), lambda i: (i, 0)),
                resident(w1), resident(b1),
                resident(w2), resident(b2),
                resident(w3p), resident(b3p),
            ],
            out_specs=pl.BlockSpec((tm, OUT_PAD), lambda i: (i, 0)),
        ),
        compiler_params=pltpu.CompilerParams(
            # Batch tiles are independent -> shard across v7x's 2 TCs;
            # harmless no-op on v5e/v6e.
            dimension_semantics=("parallel",),
        ),
    )(x, w1, b1, w2, b2, w3p, b3p)

    return out[:batch, :10]


def network_reference(x, params):
    """Pure-JAX reference mirroring the PyTorch forward."""
    w1, b1, w2, b2, w3, b3 = params
    h1 = jnp.maximum(x @ w1 + b1, 0.0)
    h2 = jnp.maximum(h1 @ w2 + b2, 0.0)
    logits = h2 @ w3 + b3
    return jax.nn.softmax(logits, axis=1)


def init_params(key):
    """Deterministic init mirroring nn.Linear default (uniform +/- 1/sqrt(fan_in))."""
    dims = [(784, 128), (128, 64), (64, 10)]
    params = []
    for i, (fan_in, fan_out) in enumerate(dims):
        kw, kb = jax.random.split(jax.random.fold_in(key, i))
        bound = 1.0 / (fan_in ** 0.5)
        w = jax.random.uniform(kw, (fan_in, fan_out), jnp.float32, -bound, bound)
        b = jax.random.uniform(kb, (1, fan_out), jnp.float32, -bound, bound)
        params += [w, b]
    return tuple(params)


if __name__ == "__main__":
    key = jax.random.PRNGKey(0)
    params = init_params(key)

    # Small batch (single tile, grid=(1,)).
    x = jax.random.normal(jax.random.fold_in(key, 99), (8, 784), jnp.float32)
    out = network_forward(x, params)
    jax.block_until_ready(out)
    assert out.shape == (8, 10)
    assert jnp.allclose(jnp.sum(out, axis=1), 1.0, atol=1e-3)
    ref = network_reference(x, params)
    assert jnp.allclose(out, ref, atol=2e-3, rtol=2e-3)

    # Larger batch exercising the batch grid + padding path (tm=64 -> grid=4).
    x2 = jax.random.normal(jax.random.fold_in(key, 100), (200, 784), jnp.float32)
    out2 = network_forward(x2, params, tm=64)
    jax.block_until_ready(out2)
    assert out2.shape == (200, 10)
    assert jnp.allclose(jnp.sum(out2, axis=1), 1.0, atol=1e-3)
    ref2 = network_reference(x2, params)
    assert jnp.allclose(out2, ref2, atol=2e-3, rtol=2e-3)

    print("KERNEL_OK")
</pallas_src>

<mosaic_0001>
module attributes {stable_mosaic.version = 11 : i64} {
  func.func @mlp_softmax_kernel(%arg0: i32, %arg1: memref<8x784xf32, #tpu.memory_space<vmem>>, %arg2: memref<784x128xf32, #tpu.memory_space<vmem>>, %arg3: memref<1x128xf32, #tpu.memory_space<vmem>>, %arg4: memref<128x64xf32, #tpu.memory_space<vmem>>, %arg5: memref<1x64xf32, #tpu.memory_space<vmem>>, %arg6: memref<64x128xf32, #tpu.memory_space<vmem>>, %arg7: memref<1x128xf32, #tpu.memory_space<vmem>>, %arg8: memref<8x128xf32, #tpu.memory_space<vmem>>) attributes {dimension_semantics = [#tpu.dimension_semantics<parallel>], iteration_bounds = array<i64: 1>, scalar_prefetch = 0 : i64, scratch_operands = 0 : i64, tpu.core_type = #tpu.core_type<tc>, window_params = [{transform_indices = @transform_0, window_bounds = array<i64: 8, 784>}, {pipeline_mode = #tpu.pipeline_mode<synchronous>, transform_indices = @transform_1, window_bounds = array<i64: 784, 128>}, {pipeline_mode = #tpu.pipeline_mode<synchronous>, transform_indices = @transform_2, window_bounds = array<i64: 1, 128>}, {pipeline_mode = #tpu.pipeline_mode<synchronous>, transform_indices = @transform_3, window_bounds = array<i64: 128, 64>}, {pipeline_mode = #tpu.pipeline_mode<synchronous>, transform_indices = @transform_4, window_bounds = array<i64: 1, 64>}, {pipeline_mode = #tpu.pipeline_mode<synchronous>, transform_indices = @transform_5, window_bounds = array<i64: 64, 128>}, {pipeline_mode = #tpu.pipeline_mode<synchronous>, transform_indices = @transform_6, window_bounds = array<i64: 1, 128>}, {transform_indices = @transform_7, window_bounds = array<i64: 8, 128>}]} {
    %c0 = arith.constant 0 : index
    %c0_0 = arith.constant 0 : index
    %0 = vector.load %arg3[%c0, %c0_0] : memref<1x128xf32, #tpu.memory_space<vmem>>, vector<1x128xf32>
    %c0_1 = arith.constant 0 : index
    %c0_2 = arith.constant 0 : index
    %1 = vector.load %arg5[%c0_1, %c0_2] : memref<1x64xf32, #tpu.memory_space<vmem>>, vector<1x64xf32>
    %c0_3 = arith.constant 0 : index
    %c0_4 = arith.constant 0 : index
    %2 = vector.load %arg7[%c0_3, %c0_4] : memref<1x128xf32, #tpu.memory_space<vmem>>, vector<1x128xf32>
    %c0_5 = arith.constant 0 : index
    %c0_6 = arith.constant 0 : index
    %3 = vector.load %arg1[%c0_5, %c0_6] : memref<8x784xf32, #tpu.memory_space<vmem>>, vector<8x784xf32>
    %c0_7 = arith.constant 0 : index
    %c0_8 = arith.constant 0 : index
    %4 = vector.load %arg2[%c0_7, %c0_8] : memref<784x128xf32, #tpu.memory_space<vmem>>, vector<784x128xf32>
    %cst = arith.constant dense<0.000000e+00> : vector<8x128xf32>
    %5 = tpu.matmul %3, %4, %cst {dimension_numbers = #tpu.dot_dimension_numbers<[1], [0], [0], [1], [0, 0, 1, 1], [], []>} : vector<8x784xf32>, vector<784x128xf32>, vector<8x128xf32> -> vector<8x128xf32>
    %6 = vector.broadcast %0 : vector<1x128xf32> to vector<8x128xf32>
    %7 = arith.addf %5, %6 : vector<8x128xf32>
    %cst_9 = arith.constant 0.000000e+00 : f32
    %8 = vector.broadcast %cst_9 : f32 to vector<8x128xf32>
    %9 = arith.maximumf %7, %8 : vector<8x128xf32>
    %c0_10 = arith.constant 0 : index
    %c0_11 = arith.constant 0 : index
    %10 = vector.load %arg4[%c0_10, %c0_11] : memref<128x64xf32, #tpu.memory_space<vmem>>, vector<128x64xf32>
    %cst_12 = arith.constant dense<0.000000e+00> : vector<8x64xf32>
    %11 = tpu.matmul %9, %10, %cst_12 {dimension_numbers = #tpu.dot_dimension_numbers<[1], [0], [0], [1], [0, 0, 1, 1], [], []>} : vector<8x128xf32>, vector<128x64xf32>, vector<8x64xf32> -> vector<8x64xf32>
    %12 = vector.broadcast %1 : vector<1x64xf32> to vector<8x64xf32>
    %13 = arith.addf %11, %12 : vector<8x64xf32>
    %cst_13 = arith.constant 0.000000e+00 : f32
    %14 = vector.broadcast %cst_13 : f32 to vector<8x64xf32>
    %15 = arith.maximumf %13, %14 : vector<8x64xf32>
    %c0_14 = arith.constant 0 : index
    %c0_15 = arith.constant 0 : index
    %16 = vector.load %arg6[%c0_14, %c0_15] : memref<64x128xf32, #tpu.memory_space<vmem>>, vector<64x128xf32>
    %cst_16 = arith.constant dense<0.000000e+00> : vector<8x128xf32>
    %17 = tpu.matmul %15, %16, %cst_16 {dimension_numbers = #tpu.dot_dimension_numbers<[1], [0], [0], [1], [0, 0, 1, 1], [], []>} : vector<8x64xf32>, vector<64x128xf32>, vector<8x128xf32> -> vector<8x128xf32>
    %18 = vector.broadcast %2 : vector<1x128xf32> to vector<8x128xf32>
    %19 = arith.addf %17, %18 : vector<8x128xf32>
    %cst_17 = arith.constant dense<0xFF800000> : vector<8xf32>
    %20 = vector.multi_reduction <maximumf>, %19, %cst_17 [1] : vector<8x128xf32> to vector<8xf32>
    %21 = vector.shape_cast %20 : vector<8xf32> to vector<8x1xf32>
    %22 = vector.broadcast %21 : vector<8x1xf32> to vector<8x128xf32>
    %23 = arith.subf %19, %22 : vector<8x128xf32>
    %24 = math.exp %23 : vector<8x128xf32>
    %cst_18 = arith.constant dense<0.000000e+00> : vector<8xf32>
    %25 = vector.multi_reduction <add>, %24, %cst_18 [1] : vector<8x128xf32> to vector<8xf32>
    %26 = vector.shape_cast %25 : vector<8xf32> to vector<8x1xf32>
    %27 = vector.broadcast %26 : vector<8x1xf32> to vector<8x128xf32>
    %28 = arith.divf %24, %27 : vector<8x128xf32>
    %c0_19 = arith.constant 0 : index
    %c0_20 = arith.constant 0 : index
    %29 = vector.load %arg8[%c0_19, %c0_20] : memref<8x128xf32, #tpu.memory_space<vmem>>, vector<8x128xf32>
    tpu.vector_store %arg8[%c0_19, %c0_20], %28 {strides = array<i32>} : memref<8x128xf32, #tpu.memory_space<vmem>>, vector<8x128xf32>,
    return
  }
  func.func @transform_0(%arg0: i32) -> (i32, i32) {
    %c0_i32 = arith.constant 0 : i32
    %c0_i32_0 = arith.constant 0 : i32
    return %arg0, %c0_i32 : i32, i32
  }
  func.func @transform_1(%arg0: i32) -> (i32, i32) {
    %c0_i32 = arith.constant 0 : i32
    %c0_i32_0 = arith.constant 0 : i32
    %c0_i32_1 = arith.constant 0 : i32
    return %c0_i32, %c0_i32_0 : i32, i32
  }
  func.func @transform_2(%arg0: i32) -> (i32, i32) {
    %c0_i32 = arith.constant 0 : i32
    %c0_i32_0 = arith.constant 0 : i32
    %c0_i32_1 = arith.constant 0 : i32
    return %c0_i32, %c0_i32_0 : i32, i32
  }
  func.func @transform_3(%arg0: i32) -> (i32, i32) {
    %c0_i32 = arith.constant 0 : i32
    %c0_i32_0 = arith.constant 0 : i32
    %c0_i32_1 = arith.constant 0 : i32
    return %c0_i32, %c0_i32_0 : i32, i32
  }
  func.func @transform_4(%arg0: i32) -> (i32, i32) {
    %c0_i32 = arith.constant 0 : i32
    %c0_i32_0 = arith.constant 0 : i32
    %c0_i32_1 = arith.constant 0 : i32
    return %c0_i32, %c0_i32_0 : i32, i32
  }
  func.func @transform_5(%arg0: i32) -> (i32, i32) {
    %c0_i32 = arith.constant 0 : i32
    %c0_i32_0 = arith.constant 0 : i32
    %c0_i32_1 = arith.constant 0 : i32
    return %c0_i32, %c0_i32_0 : i32, i32
  }
  func.func @transform_6(%arg0: i32) -> (i32, i32) {
    %c0_i32 = arith.constant 0 : i32
    %c0_i32_0 = arith.constant 0 : i32
    %c0_i32_1 = arith.constant 0 : i32
    return %c0_i32, %c0_i32_0 : i32, i32
  }
  func.func @transform_7(%arg0: i32) -> (i32, i32) {
    %c0_i32 = arith.constant 0 : i32
    %c0_i32_0 = arith.constant 0 : i32
    return %arg0, %c0_i32 : i32, i32
  }
}

</mosaic_0001>

<bundles_post_ra>
// kernel: tpu_custom_call.1
= control target key start
LH: loop header
LB: loop body
LE: loop exit
PB: predicated region body
PF: predicated region fallthrough
CT: control target
= control target key end

     0   :  { %12 = vsyncpa [#allocation3], 0  ;;  %s1229_s0 = inlined_call_operand.vmem [shape: f32[8,784], index: 0, kind: input, shape index: {}]   ;;  %s1230_s1 = inlined_call_operand.hbm [shape: f32[784,128], index: 1, kind: input, shape index: {}]   ;;  %s1231_s2 = inlined_call_operand.vmem [shape: f32[1,128], index: 2, kind: input, shape index: {}]   ;;  %s1232_s3 = inlined_call_operand.vmem [shape: f32[128,64], index: 3, kind: input, shape index: {}]   ;;  %s1233_s4 = inlined_call_operand.vmem [shape: f32[1,64], index: 4, kind: input, shape index: {}]   ;;  %s1234_s5 = inlined_call_operand.vmem [shape: f32[64,128], index: 5, kind: input, shape index: {}]   ;;  %s1235_s6 = inlined_call_operand.vmem [shape: f32[1,128], index: 6, kind: input, shape index: {}]   ;;  %s1236_s7 = inlined_call_operand.hbm [shape: f32[8,128], index: 7, kind: output, shape index: {}]  }
   0x1   :  { %13 = vsyncpa [#allocation4], 0  ;;  %s1040_s24 = smov [#allocation2]   ;;  %s992_s28 = scalar_lea.hbm %s1230_s1, 12544 }
   0x2   :  { %s21_s25 = sshll.u32 %s1040_s24, 4  ;;  %p993_p0 = scmp.ne.s32.totalorder %s1230_s1, %s992_s28  ;;  %s22_s25 = int_to_ptr.vmem [resolvable:$true] %s21_s25 }
   0x3   :  { %p996_p1 = scmp.lt.u32.totalorder %s992_s28, %s1230_s1 }
   0x5   :  { %p998_p2 = pnand %p996_p1, %p993_p0 }
   0x7   :  { %1001 = shalt.err (!%p998_p2)
}
   0x8   :  { %s1002_s10 = scalar_lea.vmem %s22_s25, 12544  ;;  %p1007_p4 = scmp.lt.s32.totalorder %s22_s25, %s22_s25 }
   0x9   :  { %p1003_p3 = scmp.ne.s32.totalorder %s22_s25, %s1002_s10  ;;  %p1008_p5 = scmp.lt.s32.totalorder %s1002_s10, %s1002_s10 }
   0xb   :  { %p1009_p6 = por %p1008_p5, %p1007_p4 }
   0xd   :  { %p1010_p7 = pnand %p1009_p6, %p1003_p3 }
   0xf   :  { %1013 = shalt.err (!%p1010_p7)
}
  0x10   :  { %s1041_s11 = smov 128   ;;  %s1042_s12 = smov 8  }
  0x11   :  { %27 = dma.hbm_to_vmem [thread:$0]  %s1230_s1, 12544, %s22_s25, [#allocation3], %s1041_s11, %s1041_s11, %s1042_s12  }
  0x12   :  { %1036 = dma.done.wait [#allocation3], 12544  }
  0x13   :  { %1037 = vsyncadd [#allocation3], 4294954752  ;;  %v67_v0 = vld [vmem:[#allocation2 + $0x80] sm:$0xff]  ;;  %v68_v1 = vld [vmem:[#allocation2 + $0x88] sm:$0xff]  ;;  %vm1044_vm0 = vmmov 0   ;;  %vm155_vm1 = vcmask 130048  }
  0x14   :  { %v51_v2 = vld [vmem:[#allocation2] sm:$0xff]  ;;  %v846_v3 = vpack.c.bf16 %v68_v1, %v67_v0  ;;  %v52_v4 = vld [vmem:[#allocation2 + $0x8] sm:$0xff]  ;;  %v69_v11 = vld [vmem:[#allocation2 + $0x90] sm:$0xff]  ;;  %vm547_vm2 = vcmask 523264  }
  0x15   :  { %v99_v5 = vld [vmem:[#allocation2 + $0x180] sm:$0xff]  ;;  %v100_v6 = vld [vmem:[#allocation2 + $0x188] sm:$0xff]  ;;  %v848_v7 = vpack.c.bf16 %v52_v4, %v51_v2  ;;  %v70_v13 = vld [vmem:[#allocation2 + $0x98] sm:$0xff] }
  0x16   :  { %v878_v8 = vpack.c.bf16 %v100_v6, %v99_v5  ;;  %v83_v9 = vld [vmem:[#allocation2 + $0x100] sm:$0xff]  ;;  %v84_v10 = vld [vmem:[#allocation2 + $0x108] sm:$0xff]  ;;  %847 = vmatprep.subr.bf16.mxu0 %v846_v3  ;;  %v53_v14 = vld [vmem:[#allocation2 + $0x10] sm:$0xff]  ;;  %v850_v16 = vpack.c.bf16 %v70_v13, %v69_v11 }
  0x17   :  { %v880_v12 = vpack.c.bf16 %v84_v10, %v83_v9  ;;  %v54_v15 = vld [vmem:[#allocation2 + $0x18] sm:$0xff]  ;;  %849 = vmatpush3.bf16.msra.mxu0 %v848_v7  ;;  %v101_v18 = vld [vmem:[#allocation2 + $0x190] sm:$0xff]  ;;  %v71_v23 = vld [vmem:[#allocation2 + $0xa0] sm:$0xff] }
  0x18   :  { %879 = vmatprep.subr.bf16.mxu1 %v878_v8  ;;  %v852_v17 = vpack.c.bf16 %v54_v15, %v53_v14  ;;  %v102_v19 = vld [vmem:[#allocation2 + $0x198] sm:$0xff]  ;;  %v85_v20 = vld [vmem:[#allocation2 + $0x110] sm:$0xff]  ;;  %v72_v24 = vld [vmem:[#allocation2 + $0xa8] sm:$0xff]  ;;  %851 = vmatprep.subr.bf16.mxu0 %v850_v16 }
  0x19   :  { %881 = vmatpush3.bf16.msra.mxu1 %v880_v12  ;;  %v882_v21 = vpack.c.bf16 %v102_v19, %v101_v18  ;;  %v86_v22 = vld [vmem:[#allocation2 + $0x118] sm:$0xff]  ;;  %v854_v26 = vpack.c.bf16 %v72_v24, %v71_v23  ;;  %v55_v27 = vld [vmem:[#allocation2 + $0x20] sm:$0xff]  ;;  %v56_v28 = vld [vmem:[#allocation2 + $0x28] sm:$0xff] }
  0x1a   :  { %v884_v25 = vpack.c.bf16 %v86_v22, %v85_v20  ;;  %v103_v29 = vld [vmem:[#allocation2 + $0x1a0] sm:$0xff]  ;;  %v104_v30 = vld [vmem:[#allocation2 + $0x1a8] sm:$0xff]  ;;  %v856_v33 = vpack.c.bf16 %v56_v28, %v55_v27  ;;  %v73_v35 = vld [vmem:[#allocation2 + $0xb0] sm:$0xff] }
  0x1b   :  { %883 = vmatprep.subr.bf16.mxu1 %v882_v21  ;;  %v87_v31 = vld [vmem:[#allocation2 + $0x120] sm:$0xff]  ;;  %v88_v32 = vld [vmem:[#allocation2 + $0x128] sm:$0xff]  ;;  %853 = vmatpush3.bf16.msra.mxu0 %v852_v17  ;;  %v886_v34 = vpack.c.bf16 %v104_v30, %v103_v29  ;;  %v74_v36 = vld [vmem:[#allocation2 + $0xb8] sm:$0xff] }
  0x1c   :  { %v57_v37 = vld [vmem:[#allocation2 + $0x30] sm:$0xff]  ;;  %855 = vmatprep.subr.bf16.mxu0 %v854_v26  ;;  %v888_v38 = vpack.c.bf16 %v88_v32, %v87_v31  ;;  %v858_v39 = vpack.c.bf16 %v74_v36, %v73_v35  ;;  %v58_v40 = vld [vmem:[#allocation2 + $0x38] sm:$0xff]  ;;  %v75_v46 = vld [vmem:[#allocation2 + $0xc0] sm:$0xff] }
  0x1d   :  { %885 = vmatpush3.bf16.msra.mxu1 %v884_v25  ;;  %v105_v41 = vld [vmem:[#allocation2 + $0x1b0] sm:$0xff]  ;;  %v106_v42 = vld [vmem:[#allocation2 + $0x1b8] sm:$0xff]  ;;  %v76_v47 = vld [vmem:[#allocation2 + $0xc8] sm:$0xff]  ;;  %v860_v48 = vpack.c.bf16 %v58_v40, %v57_v37 }
  0x1e   :  { %887 = vmatprep.subr.bf16.mxu1 %v886_v34  ;;  %v890_v43 = vpack.c.bf16 %v106_v42, %v105_v41  ;;  %v89_v44 = vld [vmem:[#allocation2 + $0x130] sm:$0xff]  ;;  %v90_v45 = vld [vmem:[#allocation2 + $0x138] sm:$0xff]  ;;  %v107_v49 = vld [vmem:[#allocation2 + $0x1c0] sm:$0xff]  ;;  %v862_v52 = vpack.c.bf16 %v76_v47, %v75_v46 }
  0x1f   :  { %857 = vmatpush3.bf16.msra.mxu0 %v856_v33  ;;  %v108_v50 = vld [vmem:[#allocation2 + $0x1c8] sm:$0xff]  ;;  %v892_v51 = vpack.c.bf16 %v90_v45, %v89_v44  ;;  %v59_v53 = vld [vmem:[#allocation2 + $0x40] sm:$0xff]  ;;  %v77_v58 = vld [vmem:[#allocation2 + $0xd0] sm:$0xff] }
  0x20   :  { %859 = vmatprep.subr.bf16.mxu0 %v858_v39  ;;  %v60_v54 = vld [vmem:[#allocation2 + $0x48] sm:$0xff]  ;;  %v91_v55 = vld [vmem:[#allocation2 + $0x140] sm:$0xff]  ;;  %v894_v56 = vpack.c.bf16 %v108_v50, %v107_v49  ;;  %v78_v59 = vld [vmem:[#allocation2 + $0xd8] sm:$0xff]  ;;  %v1043_v50 = vmov 0.0|0.0  }
  0x21   :  { %889 = vmatpush3.bf16.msra.mxu1 %v888_v38  ;;  %v92_v57 = vld [vmem:[#allocation2 + $0x148] sm:$0xff]  ;;  %v109_v60 = vld [vmem:[#allocation2 + $0x1d0] sm:$0xff]  ;;  %v110_v61 = vld [vmem:[#allocation2 + $0x1d8] sm:$0xff]  ;;  %v864_v62 = vpack.c.bf16 %v60_v54, %v59_v53  ;;  %v866_v0 = vpack.c.bf16 %v78_v59, %v77_v58 }
  0x22   :  { %891 = vmatprep.subr.bf16.mxu1 %v890_v43  ;;  %v896_v63 = vpack.c.bf16 %v92_v57, %v91_v55  ;;  %v61_v1 = vld [vmem:[#allocation2 + $0x50] sm:$0xff]  ;;  %v62_v2 = vld [vmem:[#allocation2 + $0x58] sm:$0xff]  ;;  %v898_v4 = vpack.c.bf16 %v110_v61, %v109_v60  ;;  %v79_v6 = vld [vmem:[#allocation2 + $0xe0] sm:$0xff]  ;;  %v1045_v60 = vmov 0.0  }
  0x23   :  { %861 = vmatpush3.bf16.msra.mxu0 %v860_v48  ;;  %v93_v3 = vld [vmem:[#allocation2 + $0x150] sm:$0xff]  ;;  %v94_v5 = vld [vmem:[#allocation2 + $0x158] sm:$0xff]  ;;  %v80_v7 = vld [vmem:[#allocation2 + $0xe8] sm:$0xff]  ;;  %v868_v10 = vpack.c.bf16 %v62_v2, %v61_v1 }
  0x24   :  { %863 = vmatprep.subr.bf16.mxu0 %v862_v52  ;;  %v111_v8 = vld [vmem:[#allocation2 + $0x1e0] sm:$0xff]  ;;  %v112_v9 = vld [vmem:[#allocation2 + $0x1e8] sm:$0xff]  ;;  %v900_v13 = vpack.c.bf16 %v94_v5, %v93_v3  ;;  %v870_v14 = vpack.c.bf16 %v80_v7, %v79_v6  ;;  %v81_v19 = vld [vmem:[#allocation2 + $0xf0] sm:$0xff] }
  0x25   :  { %893 = vmatpush3.bf16.msra.mxu1 %v892_v51  ;;  %v63_v11 = vld [vmem:[#allocation2 + $0x60] sm:$0xff]  ;;  %v45_v12 = vld [vmem:[%s1229_s0 + $0x8] sm:$0xff]  ;;  %v902_v18 = vpack.c.bf16 %v112_v9, %v111_v8  ;;  %v82_v20 = vld [vmem:[#allocation2 + $0xf8] sm:$0xff] }
  0x26   :  { %895 = vmatprep.subr.bf16.mxu1 %v894_v56  ;;  %v64_v15 = vld [vmem:[#allocation2 + $0x68] sm:$0xff]  ;;  %v95_v16 = vld [vmem:[#allocation2 + $0x160] sm:$0xff]  ;;  %223 = vmatprep.mubr.f32.mxu0 %v45_v12  ;;  %v47_v21 = vld [vmem:[%s1229_s0 + $0x18] sm:$0xff]  ;;  %v874_v26 = vpack.c.bf16 %v82_v20, %v81_v19 }
  0x27   :  { %865 = vmatpush3.bf16.msra.mxu0 %v864_v62  ;;  %v96_v17 = vld [vmem:[#allocation2 + $0x168] sm:$0xff]  ;;  %v113_v22 = vld [vmem:[#allocation2 + $0x1f0] sm:$0xff]  ;;  %v114_v23 = vld [vmem:[#allocation2 + $0x1f8] sm:$0xff]  ;;  %293 = vmatprep.mubr.f32.mxu1 %v47_v21  ;;  %v872_v24 = vpack.c.bf16 %v64_v15, %v63_v11 }
  0x28   :  { %867 = vmatprep.subr.bf16.mxu0 %v866_v0  ;;  %v904_v25 = vpack.c.bf16 %v96_v17, %v95_v16  ;;  %v65_v27 = vld [vmem:[#allocation2 + $0x70] sm:$0xff]  ;;  %v66_v28 = vld [vmem:[#allocation2 + $0x78] sm:$0xff]  ;;  %v906_v30 = vpack.c.bf16 %v114_v23, %v113_v22  ;;  %v131_v32 = vld [vmem:[#allocation2 + $0x280] sm:$0xff] }
  0x29   :  { %897 = vmatpush3.bf16.msra.mxu1 %v896_v63  ;;  %v97_v29 = vld [vmem:[#allocation2 + $0x170] sm:$0xff]  ;;  %v98_v31 = vld [vmem:[#allocation2 + $0x178] sm:$0xff]  ;;  %v132_v33 = vld [vmem:[#allocation2 + $0x288] sm:$0xff]  ;;  %v876_v34 = vpack.c.bf16 %v66_v28, %v65_v27 }
  0x2a   :  { %899 = vmatprep.subr.bf16.mxu1 %v898_v4  ;;  %v908_v35 = vpack.c.bf16 %v98_v31, %v97_v29  ;;  %v910_v36 = vpack.c.bf16 %v132_v33, %v131_v32  ;;  %v115_v37 = vld [vmem:[#allocation2 + $0x200] sm:$0xff]  ;;  %v116_v38 = vld [vmem:[#allocation2 + $0x208] sm:$0xff]  ;;  %v133_v39 = vld [vmem:[#allocation2 + $0x290] sm:$0xff] }
  0x2b   :  { %869 = vmatpush3.bf16.msra.mxu0 %v868_v10  ;;  %v134_v40 = vld [vmem:[#allocation2 + $0x298] sm:$0xff]  ;;  %v44_v41 = vld [vmem:[%s1229_s0] sm:$0xff]  ;;  %v912_v42 = vpack.c.bf16 %v116_v38, %v115_v37  ;;  %v46_v43 = vld [vmem:[%s1229_s0 + $0x10] sm:$0xff] }
  0x2c   :  { %871 = vmatprep.subr.bf16.mxu0 %v870_v14  ;;  %v117_v44 = vld [vmem:[#allocation2 + $0x210] sm:$0xff]  ;;  %v914_v45 = vpack.c.bf16 %v134_v40, %v133_v39  ;;  %v118_v46 = vld [vmem:[#allocation2 + $0x218] sm:$0xff]  ;;  %v135_v47 = vld [vmem:[#allocation2 + $0x2a0] sm:$0xff] }
  0x2d   :  { %901 = vmatpush3.bf16.msra.mxu1 %v900_v13  ;;  %v136_v48 = vld [vmem:[#allocation2 + $0x2a8] sm:$0xff]  ;;  %v147_v51 = vld [vmem:[#allocation2 + $0x300] sm:$0xff]  ;;  %v916_v54 = vpack.c.bf16 %v118_v46, %v117_v44  ;;  %v137_v58 = vld [vmem:[#allocation2 + $0x2b0] sm:$0xff] }
  0x2e   :  { %903 = vmatprep.subr.bf16.mxu1 %v902_v18  ;;  %v49_v49 = vld [vmem:[%s1229_s0 + $0x28] sm:$0xff]  ;;  %v918_v55 = vpack.c.bf16 %v136_v48, %v135_v47  ;;  %v119_v56 = vld [vmem:[#allocation2 + $0x220] sm:$0xff]  ;;  %v138_v59 = vld [vmem:[#allocation2 + $0x2b8] sm:$0xff] }
  0x2f   :  { %873 = vmatpush3.bf16.msra.mxu0 %v872_v24  ;;  %v148_v52 = vld [vmem:[#allocation2 + $0x308] sm:$0xff]  ;;  %v50_v61 = vld [vmem:[%s1229_s0 + $0x30] sm:$0xff]  ;;  %v922_v63 = vpack.c.bf16 %v138_v59, %v137_v58  ;;  %v122_v1 = vld [vmem:[#allocation2 + $0x238] sm:$0xff] }
  0x30   :  { %875 = vmatprep.subr.bf16.mxu0 %v874_v26  ;;  %v943_v53 = vpack.c.bf16 %v148_v52, %v147_v51  ;;  %v120_v57 = vld [vmem:[#allocation2 + $0x228] sm:$0xff]  ;;  %v121_v0 = vld [vmem:[#allocation2 + $0x230] sm:$0xff]  ;;  %v139_v2 = vld [vmem:[#allocation2 + $0x2c0] sm:$0xff] }
  0x31   :  { %905 = vmatpush3.bf16.msra.mxu1 %v904_v25  ;;  %v920_v62 = vpack.c.bf16 %v120_v57, %v119_v56  ;;  %v140_v3 = vld [vmem:[#allocation2 + $0x2c8] sm:$0xff]  ;;  %v924_v4 = vpack.c.bf16 %v122_v1, %v121_v0  ;;  %v123_v6 = vld [vmem:[#allocation2 + $0x240] sm:$0xff]  ;;  %v141_v8 = vld [vmem:[#allocation2 + $0x2d0] sm:$0xff] }
  0x32   :  { %907 = vmatprep.subr.bf16.mxu1 %v906_v30  ;;  %v926_v5 = vpack.c.bf16 %v140_v3, %v139_v2  ;;  %v124_v7 = vld [vmem:[#allocation2 + $0x248] sm:$0xff]  ;;  %v142_v9 = vld [vmem:[#allocation2 + $0x2d8] sm:$0xff]  ;;  %v125_v12 = vld [vmem:[#allocation2 + $0x250] sm:$0xff] }
  0x33   :  { %877 = vmatpush3.bf16.msra.mxu0 %v876_v34  ;;  %v928_v10 = vpack.c.bf16 %v124_v7, %v123_v6  ;;  %v930_v11 = vpack.c.bf16 %v142_v9, %v141_v8  ;;  %v126_v13 = vld [vmem:[#allocation2 + $0x258] sm:$0xff]  ;;  %v143_v14 = vld [vmem:[#allocation2 + $0x2e0] sm:$0xff]  ;;  %v144_v15 = vld [vmem:[#allocation2 + $0x2e8] sm:$0xff] }
  0x34   :  { %911 = vmatprep.subr.bf16.mxu0 %v910_v36  ;;  %v932_v16 = vpack.c.bf16 %v126_v13, %v125_v12  ;;  %v934_v17 = vpack.c.bf16 %v144_v15, %v143_v14  ;;  %v127_v18 = vld [vmem:[#allocation2 + $0x260] sm:$0xff]  ;;  %v128_v19 = vld [vmem:[#allocation2 + $0x268] sm:$0xff]  ;;  %v145_v20 = vld [vmem:[#allocation2 + $0x2f0] sm:$0xff] }
  0x35   :  { %909 = vmatpush3.bf16.msra.mxu1 %v908_v35  ;;  %v146_v21 = vld [vmem:[#allocation2 + $0x2f8] sm:$0xff]  ;;  %v936_v22 = vpack.c.bf16 %v128_v19, %v127_v18  ;;  %v129_v24 = vld [vmem:[#allocation2 + $0x270] sm:$0xff]  ;;  %v48_v27 = vld [vmem:[%s1229_s0 + $0x20] sm:$0xff] }
  0x36   :  { %942 = vmatprep.subr.bf16.mxu1 %v1043_v50  ;;  %224 = vmatmul.mubr.f32.vlgmr.msra.gmra.mrb[0].mxu0 %v44_v41  ;;  %v938_v23 = vpack.c.bf16 %v146_v21, %v145_v20  ;;  %v130_v25 = vld [vmem:[#allocation2 + $0x278] sm:$0xff]  ;;  %v440_v28 = vld [vmem:[%s1232_s3] sm:$0xff]  ;;  %v441_v29 = vld [vmem:[%s1232_s3 + $0x8] sm:$0xff] }
  0x37   :  { %913 = vmatpush3.bf16.msra.mxu0 %v912_v42  ;;  %363 = vmatprep.mubr.f32.mxu0 %v49_v49  ;;  %v940_v26 = vpack.c.bf16 %v130_v25, %v129_v24  ;;  %v442_v30 = vld [vmem:[%s1232_s3 + $0x10] sm:$0xff]  ;;  %v946_v31 = vpack.c.bf16 %v441_v29, %v440_v28  ;;  %v443_v32 = vld [vmem:[%s1232_s3 + $0x18] sm:$0xff]  ;;  %v444_v34 = vld [vmem:[%s1232_s3 + $0x20] sm:$0xff] }
  0x38   :  { %294 = vmatmul.mubr.f32.vlgmr.msra.gmra.mrb[0].mxu1 %v46_v43  ;;  %915 = vmatprep.subr.bf16.mxu0 %v914_v45  ;;  %v949_v33 = vpack.c.bf16 %v443_v32, %v442_v30  ;;  %v445_v35 = vld [vmem:[%s1232_s3 + $0x28] sm:$0xff]  ;;  %v446_v37 = vld [vmem:[%s1232_s3 + $0x30] sm:$0xff]  ;;  %v447_v38 = vld [vmem:[%s1232_s3 + $0x38] sm:$0xff] }
  0x39   :  { %944 = vmatpush3.bf16.msra.mxu1 %v943_v53  ;;  %789 = vmatprep.mubr.msk.f32.mxu1 %vm1044_vm0, %v1045_v60  ;;  %v952_v36 = vpack.c.bf16 %v445_v35, %v444_v34  ;;  %v955_v39 = vpack.c.bf16 %v447_v38, %v446_v37  ;;  %v448_v40 = vld [vmem:[%s1232_s3 + $0x40] sm:$0xff]  ;;  %v449_v41 = vld [vmem:[%s1232_s3 + $0x48] sm:$0xff]  ;;  %v450_v43 = vld [vmem:[%s1232_s3 + $0x50] sm:$0xff] }
  0x3a   :  { %945 = vmatprep.subr.bf16.mxu1 %v1043_v50  ;;  %v958_v42 = vpack.c.bf16 %v449_v41, %v448_v40  ;;  %v451_v44 = vld [vmem:[%s1232_s3 + $0x58] sm:$0xff]  ;;  %v452_v46 = vld [vmem:[%s1232_s3 + $0x60] sm:$0xff]  ;;  %v453_v47 = vld [vmem:[%s1232_s3 + $0x68] sm:$0xff] }
  0x3b   :  { %917 = vmatpush3.bf16.msra.mxu0 %v916_v54  ;;  %v961_v45 = vpack.c.bf16 %v451_v44, %v450_v43  ;;  %v964_v48 = vpack.c.bf16 %v453_v47, %v452_v46  ;;  %v454_v49 = vld [vmem:[%s1232_s3 + $0x70] sm:$0xff]  ;;  %v455_v51 = vld [vmem:[%s1232_s3 + $0x78] sm:$0xff]  ;;  %v533_v53 = vld [vmem:[%s1234_s5] sm:$0xff] }
  0x3c   :  { %919 = vmatprep.subr.bf16.mxu0 %v918_v55  ;;  %790 = vmatmul.mubr.msk.f32.vlgmr.msra.gmra.mrb[2].mxu1 %vm155_vm1, %v50_v61  ;;  %v967_v52 = vpack.c.bf16 %v455_v51, %v454_v49  ;;  %v534_v54 = vld [vmem:[%s1234_s5 + $0x8] sm:$0xff]  ;;  %v535_v55 = vld [vmem:[%s1234_s5 + $0x10] sm:$0xff]  ;;  %v536_v57 = vld [vmem:[%s1234_s5 + $0x18] sm:$0xff] }
  0x3d   :  { %824 = vmatprep.mubr.msk.f32.mxu1 %vm1044_vm0, %v1045_v60  ;;  %947 = vmatpush3.bf16.msra.mxu1 %v946_v31  ;;  %v970_v56 = vpack.c.bf16 %v534_v54, %v533_v53  ;;  %v973_v58 = vpack.c.bf16 %v536_v57, %v535_v55  ;;  %v537_v59 = vld [vmem:[%s1234_s5 + $0x20] sm:$0xff]  ;;  %v539_v14 = vld [vmem:[%s1234_s5 + $0x30] sm:$0xff]  ;;  %v540_v15 = vld [vmem:[%s1234_s5 + $0x38] sm:$0xff] }
  0x3e   :  { %948 = vmatprep.subr.bf16.mxu1 %v1043_v50 }
  0x3f   :  { %921 = vmatpush3.bf16.msra.mxu0 %v920_v62 }
  0x40   :  { %923 = vmatprep.subr.bf16.mxu0 %v922_v63  ;;  %v646_v63 = vld [vmem:[%s1231_s2] ss:$0 sm:$0xff] }
  0x41   :  { %950 = vmatpush3.bf16.msra.mxu1 %v949_v33 }
  0x42   :  { %951 = vmatprep.subr.bf16.mxu1 %v1043_v50 }
  0x43   :  { %925 = vmatpush3.bf16.msra.mxu0 %v924_v4 }
  0x44   :  { %927 = vmatprep.subr.bf16.mxu0 %v926_v5 }
  0x45   :  { %953 = vmatpush3.bf16.msra.mxu1 %v952_v36 }
  0x46   :  { %954 = vmatprep.subr.bf16.mxu1 %v1043_v50 }
  0x47   :  { %929 = vmatpush3.bf16.msra.mxu0 %v928_v10 }
  0x48   :  { %931 = vmatprep.subr.bf16.mxu0 %v930_v11 }
  0x49   :  { %956 = vmatpush3.bf16.msra.mxu1 %v955_v39 }
  0x4a   :  { %957 = vmatprep.subr.bf16.mxu1 %v1043_v50 }
  0x4b   :  { %933 = vmatpush3.bf16.msra.mxu0 %v932_v16  ;;  %v979_v16 = vpack.c.bf16 %v540_v15, %v539_v14 }
  0x4c   :  { %935 = vmatprep.subr.bf16.mxu0 %v934_v17  ;;  %v648_v17 = vld [vmem:[%s1233_s4] ss:$0 sm:$0xff]  ;;  %s1046_s4 = smov [#allocation5]  }
  0x4d   :  { %959 = vmatpush3.bf16.msra.mxu1 %v958_v42 }
  0x4e   :  { %960 = vmatprep.subr.bf16.mxu1 %v1043_v50 }
  0x4f   :  { %937 = vmatpush3.bf16.msra.mxu0 %v936_v22  ;;  %v649_v22 = vld [vmem:[%s1235_s6] ss:$0 sm:$0xff] }
  0x50   :  { %939 = vmatprep.subr.bf16.mxu0 %v938_v23 }
  0x51   :  { %962 = vmatpush3.bf16.msra.mxu1 %v961_v45 }
  0x52   :  { %963 = vmatprep.subr.bf16.mxu1 %v1043_v50 }
  0x53   :  { %941 = vmatpush3.bf16.msra.mxu0 %v940_v26 }
  0x54   :  { %969 = vmatprep.subr.bf16.mxu0 %v1043_v50 }
  0x55   :  { %965 = vmatpush3.bf16.msra.mxu1 %v964_v48 }
  0x56   :  { %364 = vmatmul.mubr.f32.vlgmr.msra.gmra.mrb[2].mxu0 %v48_v27  ;;  %966 = vmatprep.subr.bf16.mxu1 %v1043_v50 }
  0x57   :  { %843 = vmatprep.mubr.msk.f32.mxu0 %vm1044_vm0, %v1045_v60  ;;  %971 = vmatpush3.bf16.msra.mxu0 %v970_v56  ;;  %v538_v60 = vld [vmem:[%s1234_s5 + $0x28] sm:$0xff]  ;;  %s637_s5 = sshll.u32 %s1046_s4, 4  ;;  %s638_s5 = int_to_ptr.vmem [resolvable:$true] %s637_s5 }
  0x58   :  { %972 = vmatprep.subr.bf16.mxu0 %v1043_v50  ;;  %v976_v61 = vpack.c.bf16 %v538_v60, %v537_v59  ;;  %s1014_s30 = scalar_lea.vmem %s638_s5, 128  ;;  %p1019_p9 = scmp.lt.s32.totalorder %s638_s5, %s638_s5 }
  0x59   :  { %968 = vmatpush3.bf16.msra.mxu1 %v967_v52  ;;  %p1015_p8 = scmp.ne.s32.totalorder %s638_s5, %s1014_s30  ;;  %p1020_p10 = scmp.lt.s32.totalorder %s1014_s30, %s1014_s30 }
  0x5b   :  { %974 = vmatpush3.bf16.msra.mxu0 %v973_v58  ;;  %p1021_p11 = por %p1020_p10, %p1019_p9 }
  0x5c   :  { %975 = vmatprep.subr.bf16.mxu0 %v1043_v50 }
  0x5d   :  { %p1022_p12 = pnand %p1021_p11, %p1015_p8 }
  0x5f   :  { %977 = vmatpush3.bf16.msra.mxu0 %v976_v61 }
  0x60   :  { %978 = vmatprep.subr.bf16.mxu0 %v1043_v50 }
  0x63   :  { %980 = vmatpush3.bf16.msra.mxu0 %v979_v16 }
 0x109   :  { %v683_v62 = vpop.f32.mrb[0].mxu0 }
 0x10a   :  { %v684_v0 = vpop.f32.mrb[1].mxu0 }
 0x10b   :  { %v718_v1 = vpop.f32.mrb[0].mxu1  ;;  %v685_v2 = vadd.f32 %v684_v0, %v683_v62 }
 0x10c   :  { %v719_v3 = vpop.f32.mrb[1].mxu1 }
 0x10d   :  { %v720_v4 = vadd.f32 %v719_v3, %v718_v1  ;;  %v226_v5 = vadd.f32 %v685_v2, %v646_v63 }
 0x10f   :  { %v296_v6 = vadd.f32 %v720_v4, %v226_v5  ;;  %v435_v7 = vpop.f32.mrb[2].mxu1 }
 0x110   :  { %v791_v8 = vpop.f32.mrb[3].mxu1 }
 0x129   :  { %v753_v9 = vpop.f32.mrb[2].mxu0 }
 0x12a   :  { %v754_v10 = vpop.f32.mrb[3].mxu0 }
 0x12b   :  { %v755_v11 = vadd.f32 %v754_v10, %v753_v9 }
 0x12d   :  { %v366_v12 = vadd.f32 %v755_v11, %v296_v6 }
 0x12f   :  { %v436_v13 = vadd.f32 %v435_v7, %v366_v12 }
 0x131   :  { %v439_v50 = vmax.f32 %v436_v13, 0.0 }
 0x133   :  { %825 = vmatmul.mubr.f32.vlgmr.msra.gmra.mrb[4].mxu1 %v439_v50 }
 0x206   :  { %v528_v18 = vpop.f32.mrb[4].mxu1 }
 0x207   :  { %v529_v19 = vadd.f32 %v648_v17, %v528_v18  ;;  %v826_v20 = vpop.f32.mrb[5].mxu1 }
 0x209   :  { %v532_v21 = vmax.f32 %v529_v19, 0.0 }
 0x20b   :  { %844 = vmatmul.mubr.msk.f32.vlgmr.msra.gmra.mrb[4].mxu0 %vm547_vm2, %v532_v21 }
 0x2de   :  { %v617_v23 = vpop.f32.mrb[4].mxu0 }
 0x2df   :  { %v618_v24 = vadd.f32 %v649_v22, %v617_v23  ;;  %v845_v25 = vpop.f32.mrb[5].mxu0 }
 0x2e1   :  { %621 = vmax.xlane.f32.xlu0 %v618_v24 }
 0x36e   :  { %v622_v26 = vpop.xlane.xlu0 %621 }
 0x36f   :  { %v623_v27 = vsub.f32 %v618_v24, %v622_v26 }
 0x371   :  { %v624_v28 = vmul.f32 1.442695, %v623_v27 }
 0x373   :  { %988 = vpow2.f32 %v624_v28 }
 0x37d   :  { %v989_v29 = vpop.eup %988 }
 0x37e   :  { %626 = vadd.xlane.f32.xlu0 %v989_v29 }
 0x40b   :  { %v627_v30 = vpop.xlane.xlu0 %626 }
 0x40c   :  { %990 = vrcp.f32 %v627_v30 }
 0x416   :  { %v991_v31 = vpop.eup %990 }
 0x417   :  { %v629_v32 = vmul.f32 %v991_v31, %v989_v29 }
 0x419   :  { %630 = vst [vmem:[#allocation5] sm:$0xff] %v629_v32 }
 0x41a   :  { %1025 = shalt.err (!%p1022_p12)
}
 0x41b   :  { %s1026_s9 = scalar_lea.hbm %s1236_s7, 128 }
 0x41c   :  { %p1027_p13 = scmp.ne.s32.totalorder %s1236_s7, %s1026_s9  ;;  %p1030_p0 = scmp.lt.u32.totalorder %s1026_s9, %s1236_s7 }
 0x41e   :  { %p1032_p1 = pnand %p1030_p0, %p1027_p13 }
 0x420   :  { %1035 = shalt.err (!%p1032_p1)
}
 0x421   :  { %640 = dma.vmem_to_hbm [thread:$0]  %s638_s5, 128, %s1236_s7, [#allocation4]  }
 0x422   :  { %1038 = dma.done.wait [#allocation4], 128  }
 0x423   :  { %1039 = vsyncadd [#allocation4], 4294967168 }
 0x424   :  { %644 = vsyncpa [#allocation3], 1 }
 0x425   :  { %645 = vsyncpa [#allocation4], 1 }

</bundles_post_ra>
